<compile_context>
chip_gen: v7x
topology: tpu7x:2x2x1
jax: 0.10.0
libtpu: 0.0.40
codegen_flags: <defaults>
</compile_context>

<pallas_src>
import jax
import jax.numpy as jnp
from jax.experimental import pallas as pl
from jax.experimental.pallas import tpu as pltpu

# Small problem sizes consistent with the module.
B, H, W = 2, 16, 16
CIN, COUT, TS = 4, 8, 8
EPS = 1e-5

R = B * H                      # packed rows, ordered (b*H + h)
LIN = W * CIN                  # 64 input lanes
LOUT = W * COUT                # 128 output lanes

# Row layout of the two packed parameter slabs.
RHS1_OFF = 0
RHS2_OFF = 3 * LIN             # 192
BNRED_OFF = RHS2_OFF + 3 * LOUT  # 576
WSLAB_ROWS = BNRED_OFF + LOUT    # 704
AUX_ROWS = 16
ROW_G1, ROW_BE1, ROW_G2, ROW_BE2 = 8, 9, 10, 11


def timestep_block_kernel(x_ref, ts_ref, aux_ref, wslab_ref, out_ref):
    # Constant row-shift matrices shared by both convs: (p_up @ a)[r] = a[r-1]
    # (zero on each image's top row), (p_dn @ a)[r] = a[r+1] (zero on the
    # bottom row).  Built once in-register; the MXU handles the y-halo, so no
    # slices/concats/rolls touch VMEM and no separate border masks are needed.
    ri = jax.lax.broadcasted_iota(jnp.int32, (R, R), 0)
    ci = jax.lax.broadcasted_iota(jnp.int32, (R, R), 1)
    h_of_r = ri % H
    p_up = jnp.where((ci == ri - 1) & (h_of_r != 0), 1.0, 0.0).astype(jnp.float32)
    p_dn = jnp.where((ci == ri + 1) & (h_of_r != H - 1), 1.0, 0.0).astype(jnp.float32)

    def conv3x3(a, rhs_off, c):
        """3x3 'SAME' conv on a packed (R, W*c) slab -> (R, W*COUT).

        Three accumulating matmuls (one per ky row); the kx shifts and their
        borders are already folded into the block-tridiagonal RHS rows.
        """
        L = W * c
        up = jnp.dot(p_up, a, preferred_element_type=jnp.float32)      # row y-1
        dn = jnp.dot(p_dn, a, preferred_element_type=jnp.float32)      # row y+1
        out = jnp.dot(a, wslab_ref[rhs_off + L:rhs_off + 2 * L, :],
                      preferred_element_type=jnp.float32)               # ky = 1
        out = out + jnp.dot(up, wslab_ref[rhs_off:rhs_off + L, :],
                            preferred_element_type=jnp.float32)         # ky = 0
        out = out + jnp.dot(dn, wslab_ref[rhs_off + 2 * L:rhs_off + 3 * L, :],
                            preferred_element_type=jnp.float32)         # ky = 2
        return out

    def bn_silu(h, g, be):
        # Train-mode BN folded to y = h*scale + shift.  One-pass stats
        # (E[x^2]-mean^2; fine at unit scale) and a single fused
        # (2,128)x(128,128) MXU push for the packed per-channel reduction.
        stats = jnp.concatenate([jnp.sum(h, axis=0, keepdims=True),
                                 jnp.sum(h * h, axis=0, keepdims=True)], axis=0)
        red = jnp.dot(stats, wslab_ref[BNRED_OFF:BNRED_OFF + LOUT, :],
                      preferred_element_type=jnp.float32)                # (2, 128)
        mean = red[0:1, :]
        var = red[1:2, :] - mean * mean
        scale = g * jax.lax.rsqrt(var + EPS)
        shift = be - mean * scale
        y = h * scale + shift
        return y * jax.nn.sigmoid(y)                                     # SiLU

    # ---- conv1 + timestep embedding (conv/linear biases dropped: per-channel
    # constants cancel exactly under train-mode BatchNorm). ----
    h = conv3x3(x_ref[...], RHS1_OFF, CIN)                               # (R, 128)
    t = jnp.dot(ts_ref[...], aux_ref[0:TS, :],
                preferred_element_type=jnp.float32)                      # (B, 128) packed
    h = h + jnp.broadcast_to(t[:, None, :], (B, H, LOUT)).reshape(R, LOUT)

    # ---- bn1 + SiLU ----
    h = bn_silu(h, aux_ref[ROW_G1:ROW_G1 + 1, :], aux_ref[ROW_BE1:ROW_BE1 + 1, :])

    # ---- conv2 + bn2 + SiLU; single lane-dense (32, 128) unmasked store ----
    h = conv3x3(h, RHS2_OFF, COUT)
    out_ref[...] = bn_silu(h, aux_ref[ROW_G2:ROW_G2 + 1, :],
                           aux_ref[ROW_BE2:ROW_BE2 + 1, :])


def _conv_rhs_packed(w9, cin):
    """(9, cin, COUT) conv taps -> (3*W*cin, W*COUT) packed RHS.

    One block-tridiagonal group per ky row: the kx = -1/0/+1 lane-group shifts
    and their x-borders are folded into kron shift matrices (built with exact
    elementwise multiplies -- no matmul rounding), so the kernel needs no lane
    shifts and the RHS is 3x smaller than the block-diagonal im2col form.
    """
    shifts = (jnp.eye(W, k=1, dtype=jnp.float32),    # kx=0: output col w reads input w-1
              jnp.eye(W, k=0, dtype=jnp.float32),    # kx=1: same column
              jnp.eye(W, k=-1, dtype=jnp.float32))   # kx=2: output col w reads input w+1
    groups = []
    for ky in range(3):
        g = jnp.zeros((W * cin, W * COUT), jnp.float32)
        for kx in range(3):
            g = g + jnp.kron(shifts[kx], w9[3 * ky + kx])
        groups.append(g)
    return jnp.concatenate(groups, axis=0)


def pack_params(params):
    """One-time packing of module parameters into two slabs.

    Called once at init, OUTSIDE the per-step jit, so the hot path is only the
    pallas_call (perf review item 1).  b_lin/b1/b2 are intentionally omitted:
    per-channel constants cancel under train-mode BatchNorm.
    """
    aux = jnp.zeros((AUX_ROWS, LOUT), jnp.float32)
    aux = aux.at[0:TS, :].set(jnp.tile(params["w_lin"], (1, W)))   # packed ts-linear weight
    aux = aux.at[ROW_G1, :].set(jnp.tile(params["g1"], (1, W))[0])
    aux = aux.at[ROW_BE1, :].set(jnp.tile(params["be1"], (1, W))[0])
    aux = aux.at[ROW_G2, :].set(jnp.tile(params["g2"], (1, W))[0])
    aux = aux.at[ROW_BE2, :].set(jnp.tile(params["be2"], (1, W))[0])

    bnred = jnp.kron(jnp.ones((W, W), jnp.float32),
                     jnp.eye(COUT, dtype=jnp.float32)) / float(B * H * W)
    wslab = jnp.concatenate([_conv_rhs_packed(params["w1"], CIN),
                             _conv_rhs_packed(params["w2"], COUT),
                             bnred], axis=0)                        # (704, 128)
    return aux, wslab


@jax.jit
def timestep_block(x, ts, aux, wslab):
    """x: (B, H, W, CIN) NHWC; ts: (B, TS); aux/wslab: pre-packed params."""
    x_packed = x.reshape(R, LIN)   # free layout reshape of a contiguous NHWC array
    vmem = pl.BlockSpec(memory_space=pltpu.MemorySpace.VMEM)
    # TODO(synk): at these toy shapes one grid step on one TensorCore is
    #             optimal.  For larger batches on v7x, split the grid over B
    #             across the two TensorCores (halo-free) and exchange partial
    #             colsum/sqsum (CMEM/VMEM_SHARED or a two-phase reduction)
    #             before computing scale/shift -- per-tile BN statistics would
    #             otherwise silently diverge from the module.
    out2d = pl.pallas_call(
        timestep_block_kernel,
        out_shape=jax.ShapeDtypeStruct((R, LOUT), jnp.float32),
        in_specs=[vmem, vmem, vmem, vmem],
        out_specs=vmem,
    )(x_packed, ts, aux, wslab)
    return out2d.reshape(B, H, W, COUT)


def reference(x, ts, params):
    """Pure-JAX reference mirroring the PyTorch forward (NHWC, f32 precision)."""
    hp = jax.lax.Precision.HIGHEST

    def conv(h, w_hwio, b):
        y = jax.lax.conv_general_dilated(
            h, w_hwio, window_strides=(1, 1), padding="SAME",
            dimension_numbers=("NHWC", "HWIO", "NHWC"), precision=hp)
        return y + b.reshape(1, 1, 1, -1)

    def bn_silu(h, g, be):
        mean = h.mean(axis=(0, 1, 2), keepdims=True)
        var = ((h - mean) ** 2).mean(axis=(0, 1, 2), keepdims=True)
        y = (h - mean) / jnp.sqrt(var + EPS) * g.reshape(1, 1, 1, -1) \
            + be.reshape(1, 1, 1, -1)
        return y * jax.nn.sigmoid(y)

    t = jnp.dot(ts, params["w_lin"], precision=hp) + params["b_lin"].reshape(1, -1)
    h = conv(x, params["w1"].reshape(3, 3, CIN, COUT), params["b1"])
    h = h + t[:, None, None, :]
    h = bn_silu(h, params["g1"], params["be1"])
    h = conv(h, params["w2"].reshape(3, 3, COUT, COUT), params["b2"])
    return bn_silu(h, params["g2"], params["be2"])


def init_params(key):
    ks = jax.random.split(key, 6)
    return {
        # nn.Linear(ts_dims, out_channels): stored transposed (TS, COUT).
        "w_lin": jax.random.normal(ks[0], (TS, COUT), jnp.float32) * 0.1,
        "b_lin": jax.random.normal(ks[1], (1, COUT), jnp.float32) * 0.1,
        # nn.Conv2d(CIN, COUT, 3): HWIO flattened to (9, CIN, COUT)
        "w1": jax.random.normal(ks[2], (9, CIN, COUT), jnp.float32) * 0.1,
        "b1": jax.random.normal(ks[3], (1, COUT), jnp.float32) * 0.1,
        # BatchNorm2d default affine init: gamma=1, beta=0
        "g1": jnp.ones((1, COUT), jnp.float32),
        "be1": jnp.zeros((1, COUT), jnp.float32),
        # nn.Conv2d(COUT, COUT, 3)
        "w2": jax.random.normal(ks[4], (9, COUT, COUT), jnp.float32) * 0.1,
        "b2": jax.random.normal(ks[5], (1, COUT), jnp.float32) * 0.1,
        "g2": jnp.ones((1, COUT), jnp.float32),
        "be2": jnp.zeros((1, COUT), jnp.float32),
    }


if __name__ == "__main__":
    key = jax.random.PRNGKey(0)
    kx, kt, kp = jax.random.split(key, 3)

    # x: NHWC here; the PyTorch-equivalent NCHW shape is (2, 4, 16, 16).
    x = jax.random.normal(kx, (B, H, W, CIN), jnp.float32)
    ts = jax.random.normal(kt, (B, TS), jnp.float32)
    params = init_params(kp)

    # One-time parameter packing (outside the per-step jit).
    aux, wslab = pack_params(params)

    out = timestep_block(x, ts, aux, wslab)
    out = jax.block_until_ready(out)

    ref = reference(x, ts, params)
    assert out.shape == (B, H, W, COUT)
    err = jnp.max(jnp.abs(out - ref))
    assert jnp.allclose(out, ref, atol=2e-4, rtol=2e-4), f"max abs err {err}"

    print("KERNEL_OK")
</pallas_src>

<mosaic_0001>
module attributes {stable_mosaic.version = 11 : i64} {
  func.func @timestep_block_kernel(%arg0: memref<32x64xf32, #tpu.memory_space<vmem>>, %arg1: memref<2x8xf32, #tpu.memory_space<vmem>>, %arg2: memref<16x128xf32, #tpu.memory_space<vmem>>, %arg3: memref<704x128xf32, #tpu.memory_space<vmem>>, %arg4: memref<32x128xf32, #tpu.memory_space<vmem>>) attributes {dimension_semantics = [], scalar_prefetch = 0 : i64, scratch_operands = 0 : i64, tpu.core_type = #tpu.core_type<tc>} {
    %0 = tpu.iota {dimensions = array<i32: 0>} : vector<32x32xi32>
    %1 = tpu.iota {dimensions = array<i32: 1>} : vector<32x32xi32>
    %c16_i32 = arith.constant 16 : i32
    %c0_i32 = arith.constant 0 : i32
    %2 = arith.cmpi eq, %c16_i32, %c0_i32 : i32
    %c1_i32 = arith.constant 1 : i32
    %3 = arith.select %2, %c1_i32, %c16_i32 : i32
    %4 = vector.broadcast %3 : i32 to vector<32x32xi32>
    %5 = arith.remsi %0, %4 : vector<32x32xi32>
    %c0_i32_0 = arith.constant 0 : i32
    %6 = vector.broadcast %c0_i32_0 : i32 to vector<32x32xi32>
    %7 = arith.cmpi ne, %5, %6 : vector<32x32xi32>
    %c0_i32_1 = arith.constant 0 : i32
    %8 = vector.broadcast %c0_i32_1 : i32 to vector<32x32xi32>
    %9 = arith.cmpi slt, %5, %8 : vector<32x32xi32>
    %c0_i32_2 = arith.constant 0 : i32
    %10 = arith.cmpi slt, %3, %c0_i32_2 : i32
    %11 = vector.broadcast %10 : i1 to vector<32x32xi1>
    %12 = vector.broadcast %11 : vector<32x32xi1> to vector<32x32xi1>
    %13 = arith.xori %9, %12 : vector<32x32xi1>
    %14 = arith.andi %13, %7 : vector<32x32xi1>
    %15 = vector.broadcast %3 : i32 to vector<32x32xi32>
    %16 = arith.addi %5, %15 : vector<32x32xi32>
    %17 = arith.select %14, %16, %5 : vector<32x32xi1>, vector<32x32xi32>
    %c1_i32_3 = arith.constant 1 : i32
    %18 = vector.broadcast %c1_i32_3 : i32 to vector<32x32xi32>
    %19 = arith.subi %0, %18 : vector<32x32xi32>
    %20 = arith.cmpi eq, %1, %19 : vector<32x32xi32>
    %c0_i32_4 = arith.constant 0 : i32
    %21 = vector.broadcast %c0_i32_4 : i32 to vector<32x32xi32>
    %22 = arith.cmpi ne, %17, %21 : vector<32x32xi32>
    %23 = arith.andi %20, %22 : vector<32x32xi1>
    %cst = arith.constant 1.000000e+00 : f32
    %cst_5 = arith.constant 0.000000e+00 : f32
    %24 = vector.broadcast %cst : f32 to vector<32x32xf32>
    %25 = vector.broadcast %cst_5 : f32 to vector<32x32xf32>
    %26 = arith.select %23, %24, %25 : vector<32x32xi1>, vector<32x32xf32>
    %c1_i32_6 = arith.constant 1 : i32
    %27 = vector.broadcast %c1_i32_6 : i32 to vector<32x32xi32>
    %28 = arith.addi %0, %27 : vector<32x32xi32>
    %29 = arith.cmpi eq, %1, %28 : vector<32x32xi32>
    %c15_i32 = arith.constant 15 : i32
    %30 = vector.broadcast %c15_i32 : i32 to vector<32x32xi32>
    %31 = arith.cmpi ne, %17, %30 : vector<32x32xi32>
    %32 = arith.andi %29, %31 : vector<32x32xi1>
    %cst_7 = arith.constant 1.000000e+00 : f32
    %cst_8 = arith.constant 0.000000e+00 : f32
    %33 = vector.broadcast %cst_7 : f32 to vector<32x32xf32>
    %34 = vector.broadcast %cst_8 : f32 to vector<32x32xf32>
    %35 = arith.select %32, %33, %34 : vector<32x32xi1>, vector<32x32xf32>
    %c0 = arith.constant 0 : index
    %c0_9 = arith.constant 0 : index
    %36 = vector.load %arg0[%c0, %c0_9] : memref<32x64xf32, #tpu.memory_space<vmem>>, vector<32x64xf32>
    %cst_10 = arith.constant dense<0.000000e+00> : vector<32x64xf32>
    %37 = tpu.matmul %26, %36, %cst_10 {dimension_numbers = #tpu.dot_dimension_numbers<[1], [0], [0], [1], [0, 0, 1, 1], [], []>} : vector<32x32xf32>, vector<32x64xf32>, vector<32x64xf32> -> vector<32x64xf32>
    %cst_11 = arith.constant dense<0.000000e+00> : vector<32x64xf32>
    %38 = tpu.matmul %35, %36, %cst_11 {dimension_numbers = #tpu.dot_dimension_numbers<[1], [0], [0], [1], [0, 0, 1, 1], [], []>} : vector<32x32xf32>, vector<32x64xf32>, vector<32x64xf32> -> vector<32x64xf32>
    %c64 = arith.constant 64 : index
    %c0_12 = arith.constant 0 : index
    %39 = vector.load %arg3[%c64, %c0_12] : memref<704x128xf32, #tpu.memory_space<vmem>>, vector<64x128xf32>
    %cst_13 = arith.constant dense<0.000000e+00> : vector<32x128xf32>
    %40 = tpu.matmul %36, %39, %cst_13 {dimension_numbers = #tpu.dot_dimension_numbers<[1], [0], [0], [1], [0, 0, 1, 1], [], []>} : vector<32x64xf32>, vector<64x128xf32>, vector<32x128xf32> -> vector<32x128xf32>
    %c0_14 = arith.constant 0 : index
    %c0_15 = arith.constant 0 : index
    %41 = vector.load %arg3[%c0_14, %c0_15] : memref<704x128xf32, #tpu.memory_space<vmem>>, vector<64x128xf32>
    %cst_16 = arith.constant dense<0.000000e+00> : vector<32x128xf32>
    %42 = tpu.matmul %37, %41, %cst_16 {dimension_numbers = #tpu.dot_dimension_numbers<[1], [0], [0], [1], [0, 0, 1, 1], [], []>} : vector<32x64xf32>, vector<64x128xf32>, vector<32x128xf32> -> vector<32x128xf32>
    %43 = arith.addf %40, %42 : vector<32x128xf32>
    %c128 = arith.constant 128 : index
    %c0_17 = arith.constant 0 : index
    %44 = vector.load %arg3[%c128, %c0_17] : memref<704x128xf32, #tpu.memory_space<vmem>>, vector<64x128xf32>
    %cst_18 = arith.constant dense<0.000000e+00> : vector<32x128xf32>
    %45 = tpu.matmul %38, %44, %cst_18 {dimension_numbers = #tpu.dot_dimension_numbers<[1], [0], [0], [1], [0, 0, 1, 1], [], []>} : vector<32x64xf32>, vector<64x128xf32>, vector<32x128xf32> -> vector<32x128xf32>
    %46 = arith.addf %43, %45 : vector<32x128xf32>
    %c0_19 = arith.constant 0 : index
    %c0_20 = arith.constant 0 : index
    %47 = vector.load %arg1[%c0_19, %c0_20] : memref<2x8xf32, #tpu.memory_space<vmem>>, vector<2x8xf32>
    %c0_21 = arith.constant 0 : index
    %c0_22 = arith.constant 0 : index
    %48 = vector.load %arg2[%c0_21, %c0_22] : memref<16x128xf32, #tpu.memory_space<vmem>>, vector<8x128xf32>
    %cst_23 = arith.constant dense<0.000000e+00> : vector<2x128xf32>
    %49 = tpu.matmul %47, %48, %cst_23 {dimension_numbers = #tpu.dot_dimension_numbers<[1], [0], [0], [1], [0, 0, 1, 1], [], []>} : vector<2x8xf32>, vector<8x128xf32>, vector<2x128xf32> -> vector<2x128xf32>
    %50 = vector.shape_cast %49 : vector<2x128xf32> to vector<2x1x128xf32>
    %51 = vector.shape_cast %50 : vector<2x1x128xf32> to vector<2x1x128xf32>
    %52 = vector.broadcast %51 : vector<2x1x128xf32> to vector<2x16x128xf32>
    %53 = vector.shape_cast %52 : vector<2x16x128xf32> to vector<32x128xf32>
    %54 = arith.addf %46, %53 : vector<32x128xf32>
    %c8 = arith.constant 8 : index
    %c0_24 = arith.constant 0 : index
    %55 = vector.load %arg2[%c8, %c0_24] : memref<16x128xf32, #tpu.memory_space<vmem>>, vector<1x128xf32>
    %c9 = arith.constant 9 : index
    %c0_25 = arith.constant 0 : index
    %56 = vector.load %arg2[%c9, %c0_25] : memref<16x128xf32, #tpu.memory_space<vmem>>, vector<1x128xf32>
    %cst_26 = arith.constant dense<0.000000e+00> : vector<128xf32>
    %57 = vector.multi_reduction <add>, %54, %cst_26 [0] : vector<32x128xf32> to vector<128xf32>
    %58 = vector.shape_cast %57 : vector<128xf32> to vector<1x128xf32>
    %59 = arith.mulf %54, %54 : vector<32x128xf32>
    %cst_27 = arith.constant dense<0.000000e+00> : vector<128xf32>
    %60 = vector.multi_reduction <add>, %59, %cst_27 [0] : vector<32x128xf32> to vector<128xf32>
    %61 = vector.shape_cast %60 : vector<128xf32> to vector<1x128xf32>
    %62 = tpu.concatenate %58, %61 in 0 : vector<1x128xf32>, vector<1x128xf32> -> vector<2x128xf32>
    %c576 = arith.constant 576 : index
    %c0_28 = arith.constant 0 : index
    %63 = vector.load %arg3[%c576, %c0_28] : memref<704x128xf32, #tpu.memory_space<vmem>>, vector<128x128xf32>
    %cst_29 = arith.constant dense<0.000000e+00> : vector<2x128xf32>
    %64 = tpu.matmul %62, %63, %cst_29 {dimension_numbers = #tpu.dot_dimension_numbers<[1], [0], [0], [1], [0, 0, 1, 1], [], []>} : vector<2x128xf32>, vector<128x128xf32>, vector<2x128xf32> -> vector<2x128xf32>
    %65 = vector.extract_strided_slice %64 {offsets = [0, 0], sizes = [1, 128], strides = [1, 1]} : vector<2x128xf32> to vector<1x128xf32>
    %66 = vector.extract_strided_slice %64 {offsets = [1, 0], sizes = [1, 128], strides = [1, 1]} : vector<2x128xf32> to vector<1x128xf32>
    %67 = arith.mulf %65, %65 : vector<1x128xf32>
    %68 = arith.subf %66, %67 : vector<1x128xf32>
    %cst_30 = arith.constant 9.99999974E-6 : f32
    %69 = vector.broadcast %cst_30 : f32 to vector<1x128xf32>
    %70 = arith.addf %68, %69 : vector<1x128xf32>
    %71 = math.rsqrt %70 : vector<1x128xf32>
    %72 = arith.mulf %55, %71 : vector<1x128xf32>
    %73 = arith.mulf %65, %72 : vector<1x128xf32>
    %74 = arith.subf %56, %73 : vector<1x128xf32>
    %75 = vector.broadcast %72 : vector<1x128xf32> to vector<32x128xf32>
    %76 = arith.mulf %54, %75 : vector<32x128xf32>
    %77 = vector.broadcast %74 : vector<1x128xf32> to vector<32x128xf32>
    %78 = arith.addf %76, %77 : vector<32x128xf32>
    %79 = arith.negf %78 : vector<32x128xf32>
    %80 = math.exp %79 : vector<32x128xf32>
    %cst_31 = arith.constant 1.000000e+00 : f32
    %81 = vector.broadcast %cst_31 : f32 to vector<32x128xf32>
    %82 = arith.addf %81, %80 : vector<32x128xf32>
    %83 = arith.divf %81, %82 : vector<32x128xf32>
    %84 = arith.mulf %78, %83 : vector<32x128xf32>
    %cst_32 = arith.constant dense<0.000000e+00> : vector<32x128xf32>
    %85 = tpu.matmul %26, %84, %cst_32 {dimension_numbers = #tpu.dot_dimension_numbers<[1], [0], [0], [1], [0, 0, 1, 1], [], []>} : vector<32x32xf32>, vector<32x128xf32>, vector<32x128xf32> -> vector<32x128xf32>
    %cst_33 = arith.constant dense<0.000000e+00> : vector<32x128xf32>
    %86 = tpu.matmul %35, %84, %cst_33 {dimension_numbers = #tpu.dot_dimension_numbers<[1], [0], [0], [1], [0, 0, 1, 1], [], []>} : vector<32x32xf32>, vector<32x128xf32>, vector<32x128xf32> -> vector<32x128xf32>
    %c320 = arith.constant 320 : index
    %c0_34 = arith.constant 0 : index
    %87 = vector.load %arg3[%c320, %c0_34] : memref<704x128xf32, #tpu.memory_space<vmem>>, vector<128x128xf32>
    %cst_35 = arith.constant dense<0.000000e+00> : vector<32x128xf32>
    %88 = tpu.matmul %84, %87, %cst_35 {dimension_numbers = #tpu.dot_dimension_numbers<[1], [0], [0], [1], [0, 0, 1, 1], [], []>} : vector<32x128xf32>, vector<128x128xf32>, vector<32x128xf32> -> vector<32x128xf32>
    %c192 = arith.constant 192 : index
    %c0_36 = arith.constant 0 : index
    %89 = vector.load %arg3[%c192, %c0_36] : memref<704x128xf32, #tpu.memory_space<vmem>>, vector<128x128xf32>
    %cst_37 = arith.constant dense<0.000000e+00> : vector<32x128xf32>
    %90 = tpu.matmul %85, %89, %cst_37 {dimension_numbers = #tpu.dot_dimension_numbers<[1], [0], [0], [1], [0, 0, 1, 1], [], []>} : vector<32x128xf32>, vector<128x128xf32>, vector<32x128xf32> -> vector<32x128xf32>
    %91 = arith.addf %88, %90 : vector<32x128xf32>
    %c448 = arith.constant 448 : index
    %c0_38 = arith.constant 0 : index
    %92 = vector.load %arg3[%c448, %c0_38] : memref<704x128xf32, #tpu.memory_space<vmem>>, vector<128x128xf32>
    %cst_39 = arith.constant dense<0.000000e+00> : vector<32x128xf32>
    %93 = tpu.matmul %86, %92, %cst_39 {dimension_numbers = #tpu.dot_dimension_numbers<[1], [0], [0], [1], [0, 0, 1, 1], [], []>} : vector<32x128xf32>, vector<128x128xf32>, vector<32x128xf32> -> vector<32x128xf32>
    %94 = arith.addf %91, %93 : vector<32x128xf32>
    %c10 = arith.constant 10 : index
    %c0_40 = arith.constant 0 : index
    %95 = vector.load %arg2[%c10, %c0_40] : memref<16x128xf32, #tpu.memory_space<vmem>>, vector<1x128xf32>
    %c11 = arith.constant 11 : index
    %c0_41 = arith.constant 0 : index
    %96 = vector.load %arg2[%c11, %c0_41] : memref<16x128xf32, #tpu.memory_space<vmem>>, vector<1x128xf32>
    %cst_42 = arith.constant dense<0.000000e+00> : vector<128xf32>
    %97 = vector.multi_reduction <add>, %94, %cst_42 [0] : vector<32x128xf32> to vector<128xf32>
    %98 = vector.shape_cast %97 : vector<128xf32> to vector<1x128xf32>
    %99 = arith.mulf %94, %94 : vector<32x128xf32>
    %cst_43 = arith.constant dense<0.000000e+00> : vector<128xf32>
    %100 = vector.multi_reduction <add>, %99, %cst_43 [0] : vector<32x128xf32> to vector<128xf32>
    %101 = vector.shape_cast %100 : vector<128xf32> to vector<1x128xf32>
    %102 = tpu.concatenate %98, %101 in 0 : vector<1x128xf32>, vector<1x128xf32> -> vector<2x128xf32>
    %c576_44 = arith.constant 576 : index
    %c0_45 = arith.constant 0 : index
    %103 = vector.load %arg3[%c576_44, %c0_45] : memref<704x128xf32, #tpu.memory_space<vmem>>, vector<128x128xf32>
    %cst_46 = arith.constant dense<0.000000e+00> : vector<2x128xf32>
    %104 = tpu.matmul %102, %103, %cst_46 {dimension_numbers = #tpu.dot_dimension_numbers<[1], [0], [0], [1], [0, 0, 1, 1], [], []>} : vector<2x128xf32>, vector<128x128xf32>, vector<2x128xf32> -> vector<2x128xf32>
    %105 = vector.extract_strided_slice %104 {offsets = [0, 0], sizes = [1, 128], strides = [1, 1]} : vector<2x128xf32> to vector<1x128xf32>
    %106 = vector.extract_strided_slice %104 {offsets = [1, 0], sizes = [1, 128], strides = [1, 1]} : vector<2x128xf32> to vector<1x128xf32>
    %107 = arith.mulf %105, %105 : vector<1x128xf32>
    %108 = arith.subf %106, %107 : vector<1x128xf32>
    %cst_47 = arith.constant 9.99999974E-6 : f32
    %109 = vector.broadcast %cst_47 : f32 to vector<1x128xf32>
    %110 = arith.addf %108, %109 : vector<1x128xf32>
    %111 = math.rsqrt %110 : vector<1x128xf32>
    %112 = arith.mulf %95, %111 : vector<1x128xf32>
    %113 = arith.mulf %105, %112 : vector<1x128xf32>
    %114 = arith.subf %96, %113 : vector<1x128xf32>
    %115 = vector.broadcast %112 : vector<1x128xf32> to vector<32x128xf32>
    %116 = arith.mulf %94, %115 : vector<32x128xf32>
    %117 = vector.broadcast %114 : vector<1x128xf32> to vector<32x128xf32>
    %118 = arith.addf %116, %117 : vector<32x128xf32>
    %119 = arith.negf %118 : vector<32x128xf32>
    %120 = math.exp %119 : vector<32x128xf32>
    %cst_48 = arith.constant 1.000000e+00 : f32
    %121 = vector.broadcast %cst_48 : f32 to vector<32x128xf32>
    %122 = arith.addf %121, %120 : vector<32x128xf32>
    %123 = arith.divf %121, %122 : vector<32x128xf32>
    %124 = arith.mulf %118, %123 : vector<32x128xf32>
    %c0_49 = arith.constant 0 : index
    %c0_50 = arith.constant 0 : index
    %125 = vector.load %arg4[%c0_49, %c0_50] : memref<32x128xf32, #tpu.memory_space<vmem>>, vector<32x128xf32>
    tpu.vector_store %arg4[%c0_49, %c0_50], %124 {strides = array<i32>} : memref<32x128xf32, #tpu.memory_space<vmem>>, vector<32x128xf32>,
    return
  }
}

</mosaic_0001>

<bundles_post_ra>
// kernel: timestep_block.1
= control target key start
LH: loop header
LB: loop body
LE: loop exit
PB: predicated region body
PF: predicated region fallthrough
CT: control target
= control target key end

     0   :  { %9 = vsyncpa [#allocation3], 0  ;;  %s2388_s15 = smov [#allocation2]   ;;  %s2676_s0 = inlined_call_operand.vmem [shape: f32[32,64], index: 0, kind: input, shape index: {}]   ;;  %s2677_s1 = inlined_call_operand.vmem [shape: f32[2,8], index: 1, kind: input, shape index: {}]   ;;  %s2678_s2 = inlined_call_operand.vmem [shape: f32[16,128], index: 2, kind: input, shape index: {}]   ;;  %s2679_s3 = inlined_call_operand.hbm [shape: f32[704,128], index: 3, kind: input, shape index: {}]   ;;  %s2680_s4 = inlined_call_operand.vmem [shape: f32[32,128], index: 4, kind: output, shape index: {}]  }
   0x1   :  { %s21_s16 = sshll.u32 %s2388_s15, 4  ;;  %s2364_s19 = scalar_lea.hbm %s2679_s3, 11264  ;;  %s22_s16 = int_to_ptr.vmem [resolvable:$true] %s21_s16 }
   0x2   :  { %p2365_p0 = scmp.ne.s32.totalorder %s2679_s3, %s2364_s19  ;;  %p2368_p1 = scmp.lt.u32.totalorder %s2364_s19, %s2679_s3 }
   0x4   :  { %p2370_p2 = pnand %p2368_p1, %p2365_p0 }
   0x6   :  { %2373 = shalt.err (!%p2370_p2)
}
   0x7   :  { %s2374_s24 = scalar_lea.vmem %s22_s16, 11264  ;;  %p2379_p4 = scmp.lt.s32.totalorder %s22_s16, %s22_s16 }
   0x8   :  { %p2375_p3 = scmp.ne.s32.totalorder %s22_s16, %s2374_s24  ;;  %p2380_p5 = scmp.lt.s32.totalorder %s2374_s24, %s2374_s24 }
   0xa   :  { %p2381_p6 = por %p2380_p5, %p2379_p4 }
   0xc   :  { %p2382_p7 = pnand %p2381_p6, %p2375_p3 }
   0xe   :  { %2385 = shalt.err (!%p2382_p7)
}
   0xf   :  { %s2389_s25 = smov 128   ;;  %s2390_s26 = smov 8  }
  0x10   :  { %27 = dma.hbm_to_vmem [thread:$0]  %s2679_s3, 11264, %s22_s16, [#allocation3], %s2389_s25, %s2389_s25, %s2390_s26  }
  0x11   :  { %2386 = dma.done.wait [#allocation3], 11264  }
  0x12   :  { %2387 = vsyncadd [#allocation3], 4294956032  ;;  %v31_v0 = vlaneseq  ;;  %v2445_v9 = vld [vmem:[%s2676_s0] sm:$0xff]  ;;  %v2450_v10 = vld [vmem:[%s2676_s0 + $0x8] sm:$0xff]  ;;  %vm130_vm2 = vcmask 261120   ;;  %v2391_v18 = vmov 0.0  }
  0x13   :  { %v2455_v11 = vld [vmem:[%s2676_s0 + $0x10] sm:$0xff]  ;;  %v2081_v14 = vpack.c.bf16 %v2450_v10, %v2445_v9  ;;  %v2463_v15 = vld [vmem:[%s2676_s0 + $0x18] sm:$0xff]  ;;  %v333_v23 = vld [vmem:[#allocation2] sm:$0xff] }
  0x14   :  { %v2432_v1 = vshrl.u32 %v31_v0, 7  ;;  %v2434_v2 = vand.u32 127, %v31_v0  ;;  %v2085_v20 = vpack.c.bf16 %v2463_v15, %v2455_v11  ;;  %v334_v24 = vld [vmem:[#allocation2 + $0x8] sm:$0xff]  ;;  %v335_v31 = vld [vmem:[#allocation2 + $0x10] sm:$0xff]  ;;  %v336_v32 = vld [vmem:[#allocation2 + $0x18] sm:$0xff] }
  0x15   :  { %2082 = vmatprep.subr.bf16.mxu0 %v2081_v14  ;;  %2090 = vmatprep.subr.bf16.mxu1 %v2081_v14  ;;  %v2097_v30 = vpack.c.bf16 %v334_v24, %v333_v23  ;;  %v2101_v37 = vpack.c.bf16 %v336_v32, %v335_v31  ;;  %v337_v38 = vld [vmem:[#allocation2 + $0x20] sm:$0xff]  ;;  %v338_v39 = vld [vmem:[#allocation2 + $0x28] sm:$0xff]  ;;  %v339_v43 = vld [vmem:[#allocation2 + $0x30] sm:$0xff] }
  0x16   :  { %v42_v3 = vand.u32 15, %v2432_v1  ;;  %v1565_v4 = vadd.s32 4294967295, %v2432_v1  ;;  %v33_v5 = vadd.s32 8, %v2432_v1  ;;  %v34_v6 = vadd.s32 16, %v2432_v1  ;;  %2084 = vmatpush3.bf16.msra.mxu0 %v2081_v14  ;;  %2092 = vmatpush3.bf16.msra.mxu1 %v2081_v14  ;;  %v340_v44 = vld [vmem:[#allocation2 + $0x38] sm:$0xff]  ;;  %v325_v46 = vld [vmem:[#allocation2 + $0x40] sm:$0xff] }
  0x17   :  { %v106_v7 = vadd.s32 1, %v2432_v1  ;;  %v35_v17 = vadd.s32 24, %v2432_v1  ;;  %2086 = vmatprep.subr.bf16.mxu0 %v2085_v20  ;;  %2094 = vmatprep.subr.bf16.mxu1 %v2085_v20  ;;  %v2105_v42 = vpack.c.bf16 %v338_v39, %v337_v38  ;;  %v2109_v45 = vpack.c.bf16 %v340_v44, %v339_v43  ;;  %v326_v47 = vld [vmem:[#allocation2 + $0x48] sm:$0xff]  ;;  %v646_v49 = vld [vmem:[%s2678_s2] sm:$0xff]  ;;  %v327_v51 = vld [vmem:[#allocation2 + $0x50] sm:$0xff] }
  0x18   :  { %vm90_vm0 = vcmp.eq.s32.totalorder %v2434_v2, %v1565_v4  ;;  %vm94_vm1 = vcmp.ne.s32.totalorder %v42_v3, 0  ;;  %v56_v8 = vand.u32 15, %v34_v6  ;;  %v1567_v12 = vadd.s32 4294967295, %v34_v6  ;;  %v645_v50 = vld [vmem:[%s2677_s1] sm:$0x3]  ;;  %v328_v52 = vld [vmem:[#allocation2 + $0x58] sm:$0xff] }
  0x19   :  { %vm110_vm3 = vcmp.eq.s32.totalorder %v2434_v2, %v106_v7  ;;  %v49_v13 = vand.u32 15, %v33_v5  ;;  %vm98_vm4 = vmand %vm90_vm0, %vm94_vm1  ;;  %v1566_v16 = vadd.s32 4294967295, %v33_v5  ;;  %v107_v25 = vadd.s32 1, %v33_v5  ;;  %v329_v57 = vld [vmem:[#allocation2 + $0x60] sm:$0xff]  ;;  %v330_v58 = vld [vmem:[#allocation2 + $0x68] sm:$0xff] }
  0x1a   :  { %v2467_v19 = vsel %vm110_vm3, 1.0, %v2391_v18  ;;  %v2472_v21 = vsel %vm98_vm4, 1.0, %v2391_v18  ;;  %vm92_vm5 = vcmp.eq.s32.totalorder %v2434_v2, %v1567_v12  ;;  %vm2475_vm6 = vcmp.ne.s32.totalorder %v56_v8, 0  ;;  %2088 = vmatpush3.bf16.msra.mxu0 %v2085_v20  ;;  %2096 = vmatpush3.bf16.msra.mxu1 %v2085_v20  ;;  %v331_v0 = vld [vmem:[#allocation2 + $0x70] sm:$0xff]  ;;  %v536_v5 = vld [vmem:[#allocation2 + $0x80] sm:$0xff]  ;;  %v539_v12 = vld [vmem:[#allocation2 + $0x98] sm:$0xff] }
  0x1b   :  { %1792 = vmatprep.mubr.msk.f32.mxu1 %vm130_vm2, %v2467_v19  ;;  %1778 = vmatprep.mubr.msk.f32.mxu0 %vm130_vm2, %v2472_v21  ;;  %vm115_vm7 = vcmp.ne.s32.totalorder %v49_v13, 15  ;;  %v108_v26 = vadd.s32 1, %v34_v6  ;;  %v63_v27 = vand.u32 15, %v35_v17  ;;  %v109_v28 = vadd.s32 1, %v35_v17  ;;  %vm100_vm9 = vmand %vm92_vm5, %vm2475_vm6  ;;  %v537_v6 = vld [vmem:[#allocation2 + $0x88] sm:$0xff]  ;;  %v538_v8 = vld [vmem:[#allocation2 + $0x90] sm:$0xff] }
  0x1c   :  { %vm91_vm8 = vcmp.eq.s32.totalorder %v2434_v2, %v1566_v16  ;;  %v1568_v29 = vadd.s32 4294967295, %v35_v17  ;;  %vm111_vm10 = vcmp.eq.s32.totalorder %v2434_v2, %v107_v25  ;;  %v2495_v34 = vsel %vm100_vm9, 1.0, %v2391_v18  ;;  %2098 = vmatprep.subr.bf16.mxu0 %v2097_v30  ;;  %1864 = vmatprep.subr.mxu1 %v2391_v18  ;;  %v540_v14 = vld [vmem:[#allocation2 + $0xa0] sm:$0xff]  ;;  %v541_v16 = vld [vmem:[#allocation2 + $0xa8] sm:$0xff]  ;;  %v542_v17 = vld [vmem:[#allocation2 + $0xb0] sm:$0xff] }
  0x1d   :  { %vm119_vm11 = vmand %vm111_vm10, %vm115_vm7  ;;  %vm112_vm12 = vcmp.eq.s32.totalorder %v2434_v2, %v108_v26  ;;  %vm113_vm13 = vcmp.eq.s32.totalorder %v2434_v2, %v109_v28  ;;  %vm117_vm14 = vcmp.ne.s32.totalorder %v63_v27, 15  ;;  %v2492_v33 = vsel %vm91_vm8, 1.0, %v2391_v18  ;;  %v543_v20 = vld [vmem:[#allocation2 + $0xb8] sm:$0xff]  ;;  %v784_v22 = vld [vmem:[#allocation2 + $0x240] sm:$0xff] }
  0x1e   :  { %vm93_vm15 = vcmp.eq.s32.totalorder %v2434_v2, %v1568_v29  ;;  %v2499_v35 = vsel %vm119_vm11, 1.0, %v2391_v18  ;;  %v2502_v36 = vsel %vm112_vm12, 1.0, %v2391_v18  ;;  %vm121_vm0 = vmand %vm113_vm13, %vm117_vm14  ;;  %1779 = vmatmul.mubr.msk.f32.vlgmr.msra.gmra.mrb[0].mxu0 %vm130_vm2, %v2492_v33  ;;  %v2113_v48 = vpack.c.bf16 %v326_v47, %v325_v46  ;;  %v332_v2 = vld [vmem:[#allocation2 + $0x78] sm:$0xff]  ;;  %v786_v25 = vld [vmem:[#allocation2 + $0x250] sm:$0xff] }
  0x1f   :  { %1781 = vmatprep.mubr.msk.f32.mxu0 %vm130_vm2, %v2495_v34  ;;  %v2510_v40 = vsel %vm93_vm15, 1.0, %v2391_v18  ;;  %1793 = vmatmul.mubr.msk.f32.vlgmr.msra.gmra.mrb[0].mxu1 %vm130_vm2, %v2499_v35  ;;  %v2517_v41 = vsel %vm121_vm0, 1.0, %v2391_v18  ;;  %vm2392_vm1 = vmmov 0   ;;  %vm647_vm3 = vcmask 64512   ;;  %v787_v26 = vld [vmem:[#allocation2 + $0x258] sm:$0xff]  ;;  %v788_v28 = vld [vmem:[#allocation2 + $0x260] sm:$0xff] }
  0x20   :  { %1795 = vmatprep.mubr.msk.f32.mxu1 %vm130_vm2, %v2502_v36  ;;  %2100 = vmatpush3.bf16.msra.mxu0 %v2097_v30  ;;  %vm341_vm4 = vcmask 523264   ;;  %v2117_v55 = vpack.c.bf16 %v328_v52, %v327_v51  ;;  %v2121_v61 = vpack.c.bf16 %v330_v58, %v329_v57  ;;  %v2125_v4 = vpack.c.bf16 %v332_v2, %v331_v0  ;;  %v789_v29 = vld [vmem:[#allocation2 + $0x268] sm:$0xff]  ;;  %v790_v31 = vld [vmem:[#allocation2 + $0x270] sm:$0xff]  ;;  %v791_v32 = vld [vmem:[#allocation2 + $0x278] sm:$0xff] }
  0x21   :  { %2102 = vmatprep.subr.bf16.mxu0 %v2101_v37  ;;  %1865 = vmatpush3.msra.mxu1 %v646_v49  ;;  %v2129_v7 = vpack.c.bf16 %v537_v6, %v536_v5  ;;  %v2133_v13 = vpack.c.bf16 %v539_v12, %v538_v8  ;;  %v2556_v27 = vpack.c.bf16 %v787_v26, %v786_v25  ;;  %v792_v38 = vld [vmem:[#allocation2 + $0x280] sm:$0xff]  ;;  %v793_v39 = vld [vmem:[#allocation2 + $0x288] sm:$0xff]  ;;  %v794_v43 = vld [vmem:[#allocation2 + $0x290] sm:$0xff]  ;;  %v2394_v52 = vmov 1966171168  }
  0x22   :  { %1782 = vmatmul.mubr.msk.f32.gmra.mrb[2].mxu0 %vm130_vm2, %v2510_v40  ;;  %v2560_v30 = vpack.c.bf16 %v789_v29, %v788_v28  ;;  %v795_v44 = vld [vmem:[#allocation2 + $0x298] sm:$0xff]  ;;  %v796_v46 = vld [vmem:[#allocation2 + $0x2a0] sm:$0xff]  ;;  %v797_v47 = vld [vmem:[#allocation2 + $0x2a8] sm:$0xff]  ;;  %vm782_vm5 = vcmask 1040384  }
  0x23   :  { %1796 = vmatmul.mubr.msk.f32.gmra.mrb[2].mxu1 %vm130_vm2, %v2517_v41  ;;  %v798_v49 = vld [vmem:[#allocation2 + $0x2b0] sm:$0xff] }
  0x24   :  { %2104 = vmatpush3.bf16.msra.mxu0 %v2101_v37  ;;  %1866 = vmatprep.mubr.msk.f32.mxu1 %vm2392_vm1, %v2391_v18  ;;  %v2564_v37 = vpack.c.bf16 %v791_v32, %v790_v31 }
  0x25   :  { %2106 = vmatprep.subr.bf16.mxu0 %v2105_v42 }
  0x27   :  { %1867 = vmatmul.mubr.msk.f32.vlgmr.msra.gmra.mrb[4].mxu1 %vm647_vm3, %v645_v50  ;;  %v799_v50 = vld [vmem:[#allocation2 + $0x2b8] sm:$0xff] }
  0x28   :  { %2108 = vmatpush3.bf16.msra.mxu0 %v2105_v42  ;;  %1912 = vmatprep.mubr.msk.f32.mxu1 %vm130_vm2, %v2472_v21  ;;  %v2141_v21 = vpack.c.bf16 %v543_v20, %v542_v17  ;;  %v2568_v42 = vpack.c.bf16 %v793_v39, %v792_v38  ;;  %v2579_v51 = vpack.c.bf16 %v799_v50, %v798_v49 }
  0x29   :  { %2110 = vmatprep.subr.bf16.mxu0 %v2109_v45 }
  0x2c   :  { %2112 = vmatpush3.bf16.msra.mxu0 %v2109_v45  ;;  %v2572_v45 = vpack.c.bf16 %v795_v44, %v794_v43 }
  0x2d   :  { %2114 = vmatprep.subr.bf16.mxu0 %v2113_v48 }
  0xf1   :  { %v1780_v53 = vpop.f32.mrb[0].mxu0 }
  0xf2   :  { %v209_v54 = vpop.f32.mrb[1].mxu0  ;;  %v1794_v56 = vpop.f32.mrb[0].mxu1 }
  0xf3   :  { %1814 = vmatprep.mubr.msk.f32.mxu0 %vm341_vm4, %v209_v54  ;;  %v306_v59 = vpop.f32.mrb[1].mxu1 }
  0xf4   :  { %1815 = vmatmul.mubr.msk.f32.vlgmr.msra.gmra.mrb[4].mxu0 %vm341_vm4, %v1780_v53  ;;  %v723_v53 = vunpack.c.l.s4 %v2394_v52 }
  0xf5   :  { %2116 = vmatpush3.bf16.msra.mxu0 %v2113_v48  ;;  %v1783_v60 = vpop.f32.mrb[2].mxu0  ;;  %v2576_v48 = vpack.c.bf16 %v797_v47, %v796_v46 }
  0xf6   :  { %2118 = vmatprep.subr.bf16.mxu0 %v2117_v55  ;;  %v219_v62 = vpop.f32.mrb[3].mxu0  ;;  %v1797_v63 = vpop.f32.mrb[2].mxu1  ;;  %v724_v54 = vunpack.c.0.s8 %v723_v53 }
  0xf7   :  { %1817 = vmatprep.mubr.msk.f32.mxu0 %vm341_vm4, %v219_v62  ;;  %v316_v3 = vpop.f32.mrb[3].mxu1 }
  0xf8   :  { %1818 = vmatmul.mubr.msk.f32.gmra.mrb[6].mxu0 %vm341_vm4, %v1783_v60 }
  0xf9   :  { %2120 = vmatpush3.bf16.msra.mxu0 %v2117_v55  ;;  %1836 = vmatprep.mubr.msk.f32.mxu0 %vm341_vm4, %v2445_v9  ;;  %v2137_v9 = vpack.c.bf16 %v541_v16, %v540_v14  ;;  %v727_v55 = vsub.s32 %v724_v54, %v2432_v1  ;;  %v758_v54 = vld [vmem:[%s2678_s2 + $0x8] sm:$0x1] }
  0xfa   :  { %2122 = vmatprep.subr.bf16.mxu0 %v2121_v61 }
  0xfd   :  { %2124 = vmatpush3.bf16.msra.mxu0 %v2121_v61 }
  0xfe   :  { %2126 = vmatprep.subr.bf16.mxu0 %v2125_v4 }
 0x101   :  { %2128 = vmatpush3.bf16.msra.mxu0 %v2125_v4 }
 0x102   :  { %2130 = vmatprep.subr.bf16.mxu0 %v2129_v7 }
 0x104   :  { %1837 = vmatmul.mubr.msk.f32.vlgmr.msra.gmra.mrb[4].mxu0 %vm341_vm4, %v2450_v10  ;;  %v785_v10 = vld [vmem:[#allocation2 + $0x248] sm:$0xff] }
 0x105   :  { %2132 = vmatpush3.bf16.msra.mxu0 %v2129_v7  ;;  %1839 = vmatprep.mubr.msk.f32.mxu0 %vm341_vm4, %v2455_v11  ;;  %v2546_v23 = vpack.c.bf16 %v785_v10, %v784_v22  ;;  %v2393_v11 = vmov 0.0|0.0  }
 0x106   :  { %2134 = vmatprep.subr.bf16.mxu0 %v2133_v13 }
 0x108   :  { %1840 = vmatmul.mubr.msk.f32.gmra.mrb[6].mxu0 %vm341_vm4, %v2463_v15  ;;  %v717_v15 = vpop.f32.mrb[4].mxu1 }
 0x109   :  { %2136 = vmatpush3.bf16.msra.mxu0 %v2133_v13  ;;  %1858 = vmatprep.mubr.msk.f32.mxu0 %vm341_vm4, %v306_v59  ;;  %v1868_v24 = vpop.f32.mrb[5].mxu1  ;;  %v2585_v59 = vsub.s32 0, %v2432_v1 }
 0x10a   :  { %2138 = vmatprep.subr.bf16.mxu0 %v2137_v9 }
 0x10d   :  { %2140 = vmatpush3.bf16.msra.mxu0 %v2137_v9 }
 0x10e   :  { %2142 = vmatprep.subr.bf16.mxu0 %v2141_v21 }
 0x111   :  { %2144 = vmatpush3.bf16.msra.mxu0 %v2141_v21 }
 0x112   :  { %2145 = vmatprep.subr.bf16.mxu0 %v2393_v11 }
 0x114   :  { %1859 = vmatmul.mubr.msk.f32.vlgmr.msra.gmra.mrb[4].mxu0 %vm341_vm4, %v1794_v56  ;;  %v728_v56 = vrot.slane %v717_v15, %v727_v55 }
 0x115   :  { %1861 = vmatprep.mubr.msk.f32.mxu0 %vm341_vm4, %v316_v3  ;;  %2147 = vmatpush3.bf16.msra.mxu0 %v2546_v23 }
 0x116   :  { %2148 = vmatprep.subr.bf16.mxu0 %v2393_v11  ;;  %v729_v57 = vcombine.high %v728_v56, %v728_v56  ;;  %v736_v58 = vrot.slane %v728_v56, %v727_v55 }
 0x118   :  { %1862 = vmatmul.mubr.msk.f32.gmra.mrb[6].mxu0 %vm341_vm4, %v1797_v63  ;;  %v747_v60 = vrot.slane %v736_v58, %v2585_v59  ;;  %v743_v61 = vrot.slane %v729_v57, %v727_v55  ;;  %v759_v57 = vld [vmem:[%s2678_s2 + $0x9] sm:$0x1] }
 0x119   :  { %1901 = vmatprep.mubr.msk.f32.mxu0 %vm2392_vm1, %v2391_v18  ;;  %2150 = vmatpush3.bf16.msra.mxu0 %v2556_v27 }
 0x11a   :  { %2151 = vmatprep.subr.bf16.mxu0 %v2393_v11  ;;  %v751_v2 = vrot.slane %v743_v61, %v2585_v59 }
 0x11d   :  { %2153 = vmatpush3.bf16.msra.mxu0 %v2560_v30 }
 0x11e   :  { %2154 = vmatprep.subr.bf16.mxu0 %v2393_v11 }
 0x121   :  { %2156 = vmatpush3.bf16.msra.mxu0 %v2564_v37 }
 0x122   :  { %2157 = vmatprep.subr.bf16.mxu0 %v2393_v11 }
 0x125   :  { %2159 = vmatpush3.bf16.msra.mxu0 %v2568_v42 }
 0x126   :  { %2160 = vmatprep.subr.bf16.mxu0 %v2393_v11 }
 0x129   :  { %2162 = vmatpush3.bf16.msra.mxu0 %v2572_v45 }
 0x12a   :  { %2163 = vmatprep.subr.bf16.mxu0 %v2393_v11 }
 0x12d   :  { %2165 = vmatpush3.bf16.msra.mxu0 %v2576_v48 }
 0x12e   :  { %2166 = vmatprep.subr.bf16.mxu0 %v2393_v11 }
 0x131   :  { %2168 = vmatpush3.bf16.msra.mxu0 %v2579_v51 }
 0x1e7   :  { %v1860_v62 = vpop.f32.mrb[4].mxu0 }
 0x1e8   :  { %v755_v63 = vadd.f32 %v1860_v62, %v747_v60  ;;  %v622_v0 = vpop.f32.mrb[5].mxu0 }
 0x1e9   :  { %v754_v3 = vadd.f32 %v747_v60, %v622_v0 }
 0x1ea   :  { %v770_v4 = vmul.f32 %v755_v63, %v755_v63 }
 0x1eb   :  { %v769_v5 = vmul.f32 %v754_v3, %v754_v3  ;;  %v1863_v6 = vpop.f32.mrb[6].mxu0  ;;  %v760_v12 = vadd.f32 %v755_v63, %v754_v3 }
 0x1ec   :  { %v757_v7 = vadd.f32 %v1863_v6, %v751_v2  ;;  %v632_v8 = vpop.f32.mrb[7].mxu0 }
 0x1ed   :  { %v756_v13 = vadd.f32 %v751_v2, %v632_v8  ;;  %v773_v14 = vadd.f32 %v770_v4, %v769_v5 }
 0x1ee   :  { %v772_v9 = vmul.f32 %v757_v7, %v757_v7 }
 0x1ef   :  { %v761_v16 = vadd.f32 %v760_v12, %v756_v13  ;;  %v771_v1 = vmul.f32 %v756_v13, %v756_v13 }
 0x1f1   :  { %v762_v17 = vadd.f32 %v761_v16, %v757_v7  ;;  %v774_v20 = vadd.f32 %v773_v14, %v771_v1 }
 0x1f3   :  { %v763_v21 = vrot.slane %v762_v17, 4  ;;  %v775_v22 = vadd.f32 %v774_v20, %v772_v9 }
 0x1f5   :  { %v764_v10 = vadd.f32 %v763_v21, %v762_v17  ;;  %v776_v15 = vrot.slane %v775_v22, 4 }
 0x1f7   :  { %v765_v24 = vrot.slane %v764_v10, 2  ;;  %v777_v25 = vadd.f32 %v776_v15, %v775_v22 }
 0x1f9   :  { %v766_v26 = vadd.f32 %v765_v24, %v764_v10  ;;  %v778_v28 = vrot.slane %v777_v25, 2 }
 0x1fb   :  { %v767_v29 = vrot.slane %v766_v26, 1  ;;  %v779_v31 = vadd.f32 %v778_v28, %v777_v25 }
 0x1fd   :  { %v780_v32 = vrot.slane %v779_v31, 1  ;;  %v768_v38 = vadd.f32 %v767_v29, %v766_v26 }
 0x1ff   :  { %v781_v39 = vadd.f32 %v780_v32, %v779_v31 }
 0x201   :  { %v783_v43 = vsel %vm782_vm5, %v768_v38, %v781_v39  ;;  %v1113_v38 = vld [vmem:[#allocation2 + $0xc0] sm:$0xff]  ;;  %v1114_v39 = vld [vmem:[#allocation2 + $0xc8] sm:$0xff] }
 0x202   :  { %1902 = vmatmul.mubr.f32.vlgmr.msra.gmra.mrb[8].mxu0 %v783_v43 }
 0x203   :  { %1926 = vmatprep.mubr.msk.f32.mxu0 %vm130_vm2, %v2467_v19 }
 0x2d5   :  { %v866_v44 = vpop.f32.mrb[8].mxu0 }
 0x2d6   :  { %v870_v46 = vmul.f32 %v866_v44, %v866_v44  ;;  %v1903_v47 = vpop.f32.mrb[9].mxu0 }
 0x2d7   :  { %v1116_v47 = vld [vmem:[#allocation2 + $0xd8] sm:$0xff] }
 0x2d8   :  { %v872_v49 = vrot.slane %v870_v46, 7  ;;  %v1115_v46 = vld [vmem:[#allocation2 + $0xd0] sm:$0xff] }
 0x2da   :  { %v874_v50 = vsub.f32 %v866_v44, %v872_v49  ;;  %v2189_v49 = vpack.c.bf16 %v1116_v47, %v1115_v46  ;;  %v1304_v46 = vld [vmem:[#allocation2 + $0x1e8] sm:$0xff] }
 0x2dc   :  { %v875_v52 = vadd.f32 1e-05, %v874_v50  ;;  %v1117_v50 = vld [vmem:[#allocation2 + $0xe0] sm:$0xff] }
 0x2de   :  { %2328 = vrsqrt.f32 %v875_v52  ;;  %v1118_v52 = vld [vmem:[#allocation2 + $0xe8] sm:$0xff] }
 0x2e8   :  { %v2329_v53 = vpop.eup %2328 }
 0x2e9   :  { %v878_v55 = vrot.slane %v2329_v53, 1  ;;  %v2193_v53 = vpack.c.bf16 %v1118_v52, %v1117_v50  ;;  %v1306_v50 = vld [vmem:[#allocation2 + $0x1f8] sm:$0xff] }
 0x2eb   :  { %v880_v56 = vmul.f32 %v878_v55, %v758_v54  ;;  %v1124_v54 = vld [vmem:[#allocation2 + $0x118] sm:$0xff]  ;;  %v1126_v55 = vld [vmem:[#allocation2 + $0x128] sm:$0xff] }
 0x2ed   :  { %v881_v58 = vmul.f32 %v880_v56, %v866_v44  ;;  %v886_v19 = vrot.slane %v880_v56, %v2585_v59  ;;  %v2185_v44 = vpack.c.bf16 %v1114_v39, %v1113_v38  ;;  %v1127_v56 = vld [vmem:[#allocation2 + $0x130] sm:$0xff]  ;;  %v1302_v39 = vld [vmem:[#allocation2 + $0x1d8] sm:$0xff] }
 0x2ee   :  { %v1301_v38 = vld [vmem:[#allocation2 + $0x1d0] sm:$0xff] }
 0x2ef   :  { %v882_v60 = vsub.f32 %v759_v57, %v881_v58  ;;  %v887_v61 = vmul.f32 %v886_v19, %v754_v3  ;;  %v888_v0 = vmul.f32 %v886_v19, %v755_v63  ;;  %v889_v2 = vmul.f32 %v886_v19, %v756_v13  ;;  %v1128_v57 = vld [vmem:[#allocation2 + $0x138] sm:$0xff]  ;;  %v1098_v58 = vld [vmem:[#allocation2 + $0x148] sm:$0xff] }
 0x2f0   :  { %v890_v4 = vmul.f32 %v886_v19, %v757_v7 }
 0x2f1   :  { %v894_v62 = vrot.slane %v882_v60, %v2585_v59  ;;  %v1099_v60 = vld [vmem:[#allocation2 + $0x150] sm:$0xff] }
 0x2f3   :  { %v895_v5 = vadd.f32 %v894_v62, %v887_v61  ;;  %v896_v6 = vadd.f32 %v894_v62, %v888_v0  ;;  %v897_v8 = vadd.f32 %v894_v62, %v889_v2  ;;  %v898_v12 = vadd.f32 %v894_v62, %v890_v4  ;;  %v1100_v61 = vld [vmem:[#allocation2 + $0x158] sm:$0xff] }
 0x2f4   :  { %v2221_v2 = vpack.c.bf16 %v1100_v61, %v1099_v60 }
 0x2f5   :  { %v1590_v14 = vmul.f32 -1.442695, %v895_v5  ;;  %v1591_v16 = vmul.f32 -1.442695, %v896_v6  ;;  %v1592_v1 = vmul.f32 -1.442695, %v897_v8 }
 0x2f6   :  { %v1593_v9 = vmul.f32 -1.442695, %v898_v12 }
 0x2f7   :  { %2330 = vpow2.f32 %v1590_v14  ;;  %v1103_v14 = vld [vmem:[#allocation2 + $0x170] sm:$0xff] }
 0x2f8   :  { %2332 = vpow2.f32 %v1591_v16  ;;  %v1104_v16 = vld [vmem:[#allocation2 + $0x178] sm:$0xff] }
 0x2f9   :  { %2334 = vpow2.f32 %v1592_v1  ;;  %v2229_v1 = vpack.c.bf16 %v1104_v16, %v1103_v14 }
 0x2fa   :  { %2336 = vpow2.f32 %v1593_v9  ;;  %v1105_v9 = vld [vmem:[#allocation2 + $0x180] sm:$0xff] }
 0x301   :  { %v2331_v17 = vpop.eup %2330 }
 0x302   :  { %v2333_v20 = vpop.eup %2332  ;;  %v911_v3 = vadd.f32 1.0, %v2331_v17  ;;  %v1106_v17 = vld [vmem:[#allocation2 + $0x188] sm:$0xff] }
 0x303   :  { %v2335_v21 = vpop.eup %2334  ;;  %v912_v22 = vadd.f32 1.0, %v2333_v20  ;;  %v2233_v20 = vpack.c.bf16 %v1106_v17, %v1105_v9 }
 0x304   :  { %v2337_v63 = vpop.eup %2336  ;;  %2338 = vrcp.f32 %v911_v3  ;;  %v913_v7 = vadd.f32 1.0, %v2335_v21  ;;  %v1107_v3 = vld [vmem:[#allocation2 + $0x190] sm:$0xff]  ;;  %v1108_v21 = vld [vmem:[#allocation2 + $0x198] sm:$0xff] }
 0x305   :  { %2340 = vrcp.f32 %v912_v22  ;;  %v914_v13 = vadd.f32 1.0, %v2337_v63  ;;  %v2237_v22 = vpack.c.bf16 %v1108_v21, %v1107_v3  ;;  %v1109_v63 = vld [vmem:[#allocation2 + $0x1a0] sm:$0xff] }
 0x306   :  { %2342 = vrcp.f32 %v913_v7  ;;  %v1110_v7 = vld [vmem:[#allocation2 + $0x1a8] sm:$0xff] }
 0x307   :  { %2344 = vrcp.f32 %v914_v13  ;;  %v2241_v13 = vpack.c.bf16 %v1110_v7, %v1109_v63  ;;  %v1404_v7 = vld [vmem:[%s2678_s2 + $0xa] sm:$0x1] }
 0x30e   :  { %v2339_v10 = vpop.eup %2338 }
 0x30f   :  { %v2341_v15 = vpop.eup %2340  ;;  %v2600_v24 = vmul.f32 %v2339_v10, %v895_v5  ;;  %v1102_v5 = vld [vmem:[#allocation2 + $0x168] sm:$0xff]  ;;  %v1111_v10 = vld [vmem:[#allocation2 + $0x1b0] sm:$0xff] }
 0x310   :  { %v2343_v25 = vpop.eup %2342  ;;  %v2602_v26 = vmul.f32 %v2341_v15, %v896_v6  ;;  %v1112_v15 = vld [vmem:[#allocation2 + $0x1b8] sm:$0xff] }
 0x311   :  { %v2345_v28 = vpop.eup %2344  ;;  %v2604_v29 = vmul.f32 %v2343_v25, %v897_v8  ;;  %v1299_v25 = vld [vmem:[#allocation2 + $0x1c0] sm:$0xff] }
 0x312   :  { %v2169_v31 = vpack.c.bf16 %v2602_v26, %v2600_v24  ;;  %v2608_v32 = vmul.f32 %v2345_v28, %v898_v12  ;;  %v1300_v28 = vld [vmem:[#allocation2 + $0x1c8] sm:$0xff] }
 0x314   :  { %2170 = vmatprep.subr.bf16.mxu1 %v2169_v31  ;;  %2178 = vmatprep.subr.bf16.mxu0 %v2169_v31  ;;  %v2173_v43 = vpack.c.bf16 %v2608_v32, %v2604_v29 }
 0x315   :  { %2172 = vmatpush3.bf16.msra.mxu1 %v2169_v31  ;;  %2180 = vmatpush3.bf16.msra.mxu0 %v2169_v31  ;;  %v2249_v31 = vpack.c.bf16 %v1300_v28, %v1299_v25 }
 0x316   :  { %2174 = vmatprep.subr.bf16.mxu1 %v2173_v43  ;;  %2182 = vmatprep.subr.bf16.mxu0 %v2173_v43 }
 0x319   :  { %2176 = vmatpush3.bf16.msra.mxu1 %v2173_v43  ;;  %2184 = vmatpush3.bf16.msra.mxu0 %v2173_v43  ;;  %v2253_v43 = vpack.c.bf16 %v1302_v39, %v1301_v38 }
 0x31a   :  { %2186 = vmatprep.subr.bf16.mxu1 %v2185_v44  ;;  %2281 = vmatprep.subr.bf16.mxu0 %v2393_v11 }
 0x31c   :  { %1913 = vmatmul.mubr.msk.f32.vlgmr.msra.gmra.mrb[6].mxu1 %vm130_vm2, %v2492_v33  ;;  %1927 = vmatmul.mubr.msk.f32.vlgmr.msra.gmra.mrb[10].mxu0 %vm130_vm2, %v2499_v35  ;;  %v1119_v33 = vld [vmem:[#allocation2 + $0xf0] sm:$0xff]  ;;  %v1120_v35 = vld [vmem:[#allocation2 + $0xf8] sm:$0xff] }
 0x31d   :  { %1915 = vmatprep.mubr.msk.f32.mxu1 %vm130_vm2, %v2495_v34  ;;  %1929 = vmatprep.mubr.msk.f32.mxu0 %vm130_vm2, %v2502_v36  ;;  %v2197_v34 = vpack.c.bf16 %v1120_v35, %v1119_v33  ;;  %v1121_v36 = vld [vmem:[#allocation2 + $0x100] sm:$0xff]  ;;  %v1308_v33 = vld [vmem:[#allocation2 + $0x208] sm:$0xff] }
 0x31e   :  { %2188 = vmatpush3.bf16.msra.mxu1 %v2185_v44  ;;  %2283 = vmatpush3.bf16.msra.mxu0 %v2546_v23  ;;  %v1122_v23 = vld [vmem:[#allocation2 + $0x108] sm:$0xff]  ;;  %v1303_v44 = vld [vmem:[#allocation2 + $0x1e0] sm:$0xff] }
 0x31f   :  { %2190 = vmatprep.subr.bf16.mxu1 %v2189_v49  ;;  %2284 = vmatprep.subr.bf16.mxu0 %v2393_v11  ;;  %v2257_v47 = vpack.c.bf16 %v1304_v46, %v1303_v44 }
 0x320   :  { %1916 = vmatmul.mubr.msk.f32.gmra.mrb[8].mxu1 %vm130_vm2, %v2510_v40  ;;  %1930 = vmatmul.mubr.msk.f32.gmra.mrb[12].mxu0 %vm130_vm2, %v2517_v41  ;;  %v2201_v40 = vpack.c.bf16 %v1122_v23, %v1121_v36  ;;  %v1123_v41 = vld [vmem:[#allocation2 + $0x110] sm:$0xff]  ;;  %v1311_v36 = vld [vmem:[#allocation2 + $0x220] sm:$0xff]  ;;  %v1312_v23 = vld [vmem:[#allocation2 + $0x228] sm:$0xff] }
 0x321   :  { %2078 = vmatprep.mubr.msk.f32.mxu0 %vm2392_vm1, %v2391_v18  ;;  %v2205_v18 = vpack.c.bf16 %v1124_v54, %v1123_v41  ;;  %v1314_v41 = vld [vmem:[#allocation2 + $0x238] sm:$0xff] }
 0x322   :  { %2192 = vmatpush3.bf16.msra.mxu1 %v2189_v49  ;;  %2286 = vmatpush3.bf16.msra.mxu0 %v2556_v27  ;;  %v1125_v27 = vld [vmem:[#allocation2 + $0x120] sm:$0xff]  ;;  %v1305_v49 = vld [vmem:[#allocation2 + $0x1f0] sm:$0xff] }
 0x323   :  { %2194 = vmatprep.subr.bf16.mxu1 %v2193_v53  ;;  %2287 = vmatprep.subr.bf16.mxu0 %v2393_v11  ;;  %v2261_v52 = vpack.c.bf16 %v1306_v50, %v1305_v49 }
 0x326   :  { %2196 = vmatpush3.bf16.msra.mxu1 %v2193_v53  ;;  %2289 = vmatpush3.bf16.msra.mxu0 %v2560_v30  ;;  %v2209_v30 = vpack.c.bf16 %v1126_v55, %v1125_v27  ;;  %v1307_v53 = vld [vmem:[#allocation2 + $0x200] sm:$0xff] }
 0x327   :  { %2198 = vmatprep.subr.bf16.mxu1 %v2197_v34  ;;  %2290 = vmatprep.subr.bf16.mxu0 %v2393_v11  ;;  %v2265_v35 = vpack.c.bf16 %v1308_v33, %v1307_v53 }
 0x32a   :  { %2200 = vmatpush3.bf16.msra.mxu1 %v2197_v34  ;;  %2292 = vmatpush3.bf16.msra.mxu0 %v2564_v37  ;;  %v2213_v37 = vpack.c.bf16 %v1128_v57, %v1127_v56  ;;  %v1309_v34 = vld [vmem:[#allocation2 + $0x210] sm:$0xff] }
 0x32b   :  { %2202 = vmatprep.subr.bf16.mxu1 %v2201_v40  ;;  %2293 = vmatprep.subr.bf16.mxu0 %v2393_v11 }
 0x32e   :  { %2204 = vmatpush3.bf16.msra.mxu1 %v2201_v40  ;;  %2295 = vmatpush3.bf16.msra.mxu0 %v2568_v42  ;;  %v1097_v42 = vld [vmem:[#allocation2 + $0x140] sm:$0xff]  ;;  %v2273_v40 = vpack.c.bf16 %v1312_v23, %v1311_v36 }
 0x32f   :  { %2206 = vmatprep.subr.bf16.mxu1 %v2205_v18  ;;  %2296 = vmatprep.subr.bf16.mxu0 %v2393_v11  ;;  %v2217_v19 = vpack.c.bf16 %v1098_v58, %v1097_v42 }
 0x332   :  { %2208 = vmatpush3.bf16.msra.mxu1 %v2205_v18  ;;  %2298 = vmatpush3.bf16.msra.mxu0 %v2572_v45 }
 0x333   :  { %2210 = vmatprep.subr.bf16.mxu1 %v2209_v30  ;;  %2299 = vmatprep.subr.bf16.mxu0 %v2393_v11 }
 0x336   :  { %2212 = vmatpush3.bf16.msra.mxu1 %v2209_v30  ;;  %2301 = vmatpush3.bf16.msra.mxu0 %v2576_v48  ;;  %v1101_v48 = vld [vmem:[#allocation2 + $0x160] sm:$0xff] }
 0x337   :  { %2214 = vmatprep.subr.bf16.mxu1 %v2213_v37  ;;  %2302 = vmatprep.subr.bf16.mxu0 %v2393_v11  ;;  %v2225_v8 = vpack.c.bf16 %v1102_v5, %v1101_v48 }
 0x33a   :  { %2216 = vmatpush3.bf16.msra.mxu1 %v2213_v37  ;;  %2304 = vmatpush3.bf16.msra.mxu0 %v2579_v51 }
 0x33b   :  { %2218 = vmatprep.subr.bf16.mxu1 %v2217_v19 }
 0x3ef   :  { %v1914_v45 = vpop.f32.mrb[6].mxu1  ;;  %v2642_v62 = vpop.f32.mrb[10].mxu0 }
 0x3f0   :  { %v993_v0 = vpop.f32.mrb[7].mxu1  ;;  %v1078_v4 = vpop.f32.mrb[11].mxu0 }
 0x3f1   :  { %1964 = vmatprep.mubr.f32.mxu1 %v993_v0 }
 0x3f2   :  { %1965 = vmatmul.mubr.f32.vlgmr.msra.gmra.mrb[10].mxu1 %v1914_v45 }
 0x3f3   :  { %2220 = vmatpush3.bf16.msra.mxu1 %v2217_v19  ;;  %v1917_v11 = vpop.f32.mrb[8].mxu1  ;;  %v2644_v6 = vpop.f32.mrb[12].mxu0 }
 0x3f4   :  { %v1003_v51 = vpop.f32.mrb[9].mxu1  ;;  %2222 = vmatprep.subr.bf16.mxu1 %v2221_v2  ;;  %v2646_v12 = vpop.f32.mrb[13].mxu0 }
 0x3f5   :  { %1967 = vmatprep.mubr.f32.mxu1 %v1003_v51 }
 0x3f6   :  { %1968 = vmatmul.mubr.f32.gmra.mrb[12].mxu1 %v1917_v11 }
 0x3f7   :  { %2224 = vmatpush3.bf16.msra.mxu1 %v2221_v2  ;;  %2002 = vmatprep.mubr.f32.mxu1 %v2600_v24  ;;  %v2245_v24 = vpack.c.bf16 %v1112_v15, %v1111_v10  ;;  %v1405_v15 = vld [vmem:[%s2678_s2 + $0xb] sm:$0x1] }
 0x3f8   :  { %2226 = vmatprep.subr.bf16.mxu1 %v2225_v8 }
 0x3fb   :  { %2228 = vmatpush3.bf16.msra.mxu1 %v2225_v8 }
 0x3fc   :  { %2230 = vmatprep.subr.bf16.mxu1 %v2229_v1 }
 0x3ff   :  { %2232 = vmatpush3.bf16.msra.mxu1 %v2229_v1 }
 0x400   :  { %2234 = vmatprep.subr.bf16.mxu1 %v2233_v20 }
 0x403   :  { %2236 = vmatpush3.bf16.msra.mxu1 %v2233_v20 }
 0x404   :  { %2238 = vmatprep.subr.bf16.mxu1 %v2237_v22 }
 0x407   :  { %2240 = vmatpush3.bf16.msra.mxu1 %v2237_v22 }
 0x408   :  { %2242 = vmatprep.subr.bf16.mxu1 %v2241_v13 }
 0x40b   :  { %2244 = vmatpush3.bf16.msra.mxu1 %v2241_v13 }
 0x40c   :  { %2246 = vmatprep.subr.bf16.mxu1 %v2245_v24 }
 0x40f   :  { %2248 = vmatpush3.bf16.msra.mxu1 %v2245_v24 }
 0x410   :  { %2250 = vmatprep.subr.bf16.mxu1 %v2249_v31 }
 0x412   :  { %2003 = vmatmul.mubr.f32.vlgmr.msra.gmra.mrb[10].mxu1 %v2602_v26  ;;  %v1310_v26 = vld [vmem:[#allocation2 + $0x218] sm:$0xff] }
 0x413   :  { %2005 = vmatprep.mubr.f32.mxu1 %v2604_v29  ;;  %2252 = vmatpush3.bf16.msra.mxu1 %v2249_v31  ;;  %v2269_v29 = vpack.c.bf16 %v1310_v26, %v1309_v34 }
 0x414   :  { %2254 = vmatprep.subr.bf16.mxu1 %v2253_v43 }
 0x416   :  { %2006 = vmatmul.mubr.f32.gmra.mrb[12].mxu1 %v2608_v32  ;;  %v1313_v32 = vld [vmem:[#allocation2 + $0x230] sm:$0xff] }
 0x417   :  { %2256 = vmatpush3.bf16.msra.mxu1 %v2253_v43  ;;  %2040 = vmatprep.mubr.f32.mxu1 %v1078_v4  ;;  %v2277_v54 = vpack.c.bf16 %v1314_v41, %v1313_v32 }
 0x418   :  { %2258 = vmatprep.subr.bf16.mxu1 %v2257_v47 }
 0x41b   :  { %2260 = vmatpush3.bf16.msra.mxu1 %v2257_v47 }
 0x41c   :  { %2262 = vmatprep.subr.bf16.mxu1 %v2261_v52 }
 0x41f   :  { %2264 = vmatpush3.bf16.msra.mxu1 %v2261_v52 }
 0x420   :  { %2266 = vmatprep.subr.bf16.mxu1 %v2265_v35 }
 0x423   :  { %2268 = vmatpush3.bf16.msra.mxu1 %v2265_v35 }
 0x424   :  { %2270 = vmatprep.subr.bf16.mxu1 %v2269_v29 }
 0x427   :  { %2272 = vmatpush3.bf16.msra.mxu1 %v2269_v29 }
 0x428   :  { %2274 = vmatprep.subr.bf16.mxu1 %v2273_v40 }
 0x42b   :  { %2276 = vmatpush3.bf16.msra.mxu1 %v2273_v40 }
 0x42c   :  { %2278 = vmatprep.subr.bf16.mxu1 %v2277_v54 }
 0x42f   :  { %2280 = vmatpush3.bf16.msra.mxu1 %v2277_v54 }
 0x432   :  { %2041 = vmatmul.mubr.f32.vlgmr.msra.gmra.mrb[10].mxu1 %v2642_v62 }
 0x433   :  { %2043 = vmatprep.mubr.f32.mxu1 %v2646_v12 }
 0x436   :  { %2044 = vmatmul.mubr.f32.gmra.mrb[12].mxu1 %v2644_v6 }
 0x505   :  { %v2042_v18 = vpop.f32.mrb[10].mxu1 }
 0x506   :  { %v1416_v27 = vmul.f32 %v2042_v18, %v2042_v18  ;;  %v1381_v55 = vpop.f32.mrb[11].mxu1 }
 0x507   :  { %v1406_v30 = vadd.f32 %v2042_v18, %v1381_v55  ;;  %v1415_v56 = vmul.f32 %v1381_v55, %v1381_v55 }
 0x509   :  { %v1419_v57 = vadd.f32 %v1416_v27, %v1415_v56  ;;  %v2045_v37 = vpop.f32.mrb[12].mxu1 }
 0x50a   :  { %v1391_v42 = vpop.f32.mrb[13].mxu1  ;;  %v1418_v60 = vmul.f32 %v2045_v37, %v2045_v37 }
 0x50b   :  { %v1407_v58 = vadd.f32 %v1406_v30, %v1391_v42  ;;  %v1417_v19 = vmul.f32 %v1391_v42, %v1391_v42 }
 0x50d   :  { %v1408_v61 = vadd.f32 %v2045_v37, %v1407_v58  ;;  %v1420_v45 = vadd.f32 %v1419_v57, %v1417_v19 }
 0x50f   :  { %v1409_v0 = vrot.slane %v1408_v61, 4  ;;  %v1421_v2 = vadd.f32 %v1420_v45, %v1418_v60 }
 0x511   :  { %v1410_v62 = vadd.f32 %v1409_v0, %v1408_v61  ;;  %v1422_v4 = vrot.slane %v1421_v2, 4 }
 0x513   :  { %v1411_v48 = vrot.slane %v1410_v62, 2  ;;  %v1423_v5 = vadd.f32 %v1422_v4, %v1421_v2 }
 0x515   :  { %v1412_v11 = vadd.f32 %v1411_v48, %v1410_v62  ;;  %v1424_v6 = vrot.slane %v1423_v5, 2 }
 0x517   :  { %v1413_v51 = vrot.slane %v1412_v11, 1  ;;  %v1425_v8 = vadd.f32 %v1424_v6, %v1423_v5 }
 0x519   :  { %v1426_v12 = vrot.slane %v1425_v8, 1  ;;  %v1414_v14 = vadd.f32 %v1413_v51, %v1412_v11 }
 0x51b   :  { %v1427_v16 = vadd.f32 %v1426_v12, %v1425_v8 }
 0x51d   :  { %v1428_v1 = vsel %vm782_vm5, %v1414_v14, %v1427_v16 }
 0x51e   :  { %2079 = vmatmul.mubr.f32.vlgmr.msra.gmra.mrb[14].mxu0 %v1428_v1 }
 0x5f1   :  { %v1495_v9 = vpop.f32.mrb[14].mxu0 }
 0x5f2   :  { %v1499_v17 = vmul.f32 %v1495_v9, %v1495_v9  ;;  %v2080_v20 = vpop.f32.mrb[15].mxu0 }
 0x5f4   :  { %v1501_v3 = vrot.slane %v1499_v17, 7 }
 0x5f6   :  { %v1503_v21 = vsub.f32 %v1495_v9, %v1501_v3 }
 0x5f8   :  { %v1504_v22 = vadd.f32 1e-05, %v1503_v21 }
 0x5fa   :  { %2346 = vrsqrt.f32 %v1504_v22 }
 0x604   :  { %v2347_v63 = vpop.eup %2346 }
 0x605   :  { %v1507_v13 = vrot.slane %v2347_v63, 1 }
 0x607   :  { %v1509_v10 = vmul.f32 %v1507_v13, %v1404_v7 }
 0x609   :  { %v1510_v24 = vmul.f32 %v1509_v10, %v1495_v9  ;;  %v1515_v25 = vrot.slane %v1509_v10, %v2585_v59 }
 0x60b   :  { %v1511_v28 = vsub.f32 %v1405_v15, %v1510_v24  ;;  %v1516_v31 = vmul.f32 %v1515_v25, %v1381_v55  ;;  %v1517_v38 = vmul.f32 %v2042_v18, %v1515_v25  ;;  %v1518_v39 = vmul.f32 %v1515_v25, %v1391_v42 }
 0x60c   :  { %v1519_v43 = vmul.f32 %v2045_v37, %v1515_v25 }
 0x60d   :  { %v1523_v44 = vrot.slane %v1511_v28, %v2585_v59 }
 0x60f   :  { %v1524_v46 = vadd.f32 %v1523_v44, %v1516_v31  ;;  %v1525_v47 = vadd.f32 %v1523_v44, %v1517_v38  ;;  %v1526_v49 = vadd.f32 %v1523_v44, %v1518_v39  ;;  %v1527_v50 = vadd.f32 %v1523_v44, %v1519_v43 }
 0x611   :  { %v1602_v52 = vmul.f32 -1.442695, %v1524_v46  ;;  %v1603_v53 = vmul.f32 -1.442695, %v1525_v47  ;;  %v1604_v33 = vmul.f32 -1.442695, %v1526_v49 }
 0x612   :  { %v1605_v35 = vmul.f32 -1.442695, %v1527_v50 }
 0x613   :  { %2348 = vpow2.f32 %v1602_v52 }
 0x614   :  { %2350 = vpow2.f32 %v1603_v53 }
 0x615   :  { %2352 = vpow2.f32 %v1604_v33 }
 0x616   :  { %2354 = vpow2.f32 %v1605_v35 }
 0x61d   :  { %v2349_v34 = vpop.eup %2348 }
 0x61e   :  { %v2351_v26 = vpop.eup %2350  ;;  %v1540_v29 = vadd.f32 1.0, %v2349_v34 }
 0x61f   :  { %v2353_v36 = vpop.eup %2352  ;;  %v1541_v23 = vadd.f32 1.0, %v2351_v26 }
 0x620   :  { %v2355_v40 = vpop.eup %2354  ;;  %v1542_v32 = vadd.f32 1.0, %v2353_v36  ;;  %2356 = vrcp.f32 %v1540_v29 }
 0x621   :  { %v1543_v59 = vadd.f32 1.0, %v2355_v40  ;;  %2358 = vrcp.f32 %v1541_v23 }
 0x622   :  { %2360 = vrcp.f32 %v1542_v32 }
 0x623   :  { %2362 = vrcp.f32 %v1543_v59 }
 0x62a   :  { %v2357_v41 = vpop.eup %2356 }
 0x62b   :  { %v2359_v54 = vpop.eup %2358  ;;  %v1552_v18 = vmul.f32 %v2357_v41, %v1524_v46 }
 0x62c   :  { %v2361_v27 = vpop.eup %2360  ;;  %v1553_v55 = vmul.f32 %v2359_v54, %v1525_v47 }
 0x62d   :  { %v2363_v30 = vpop.eup %2362  ;;  %v1554_v56 = vmul.f32 %v2361_v27, %v1526_v49  ;;  %1556 = vst [vmem:[%s2680_s4] sm:$0xff] %v1552_v18 }
 0x62e   :  { %v1555_v57 = vmul.f32 %v2363_v30, %v1527_v50  ;;  %1557 = vst [vmem:[%s2680_s4 + $0x8] sm:$0xff] %v1553_v55 }
 0x62f   :  { %1558 = vst [vmem:[%s2680_s4 + $0x10] sm:$0xff] %v1554_v56 }
 0x630   :  { %1559 = vst [vmem:[%s2680_s4 + $0x18] sm:$0xff] %v1555_v57 }
 0x631   :  { %1564 = vsyncpa [#allocation3], 1 }

</bundles_post_ra>
